<compile_context>
chip_gen: v7x
topology: tpu7x:2x2x1
jax: 0.10.0
libtpu: 0.0.40
codegen_flags: <defaults>
</compile_context>

<pallas_src>
import jax
import jax.numpy as jnp
from jax.experimental import pallas as pl
from jax.experimental.pallas import tpu as pltpu


def _sampler_kernel(ref_ref, out_ref):
    # Pass-through sampler body: concrete samplers would implement the real
    # point-sampling math here.  The template only guarantees shape/dtype
    # preservation of `ref`.
    out_ref[...] = ref_ref[...]


# Per-block VMEM budget.  With double-buffered input + output blocks the live
# VMEM footprint is ~4x this (16 MiB), which fits under the explicit 32 MiB
# scoped-VMEM limit below on every generation (v5e/v6e: 128 MiB physical,
# v7x: 64 MiB physical).
_BLOCK_BYTES_BUDGET = 4 * 1024 * 1024
_SUBLANE_MULTIPLE = 32          # unmasked vst for f32 / bf16 / int8 / fp8 alike
_VMEM_LIMIT_BYTES = 32 * 1024 * 1024


def _pick_tile_rows(total_rows: int, row_bytes: int) -> int:
    """Largest row tile that divides total_rows, is a multiple of 32 sublanes,
    and stays inside the per-block VMEM budget."""
    if total_rows <= _SUBLANE_MULTIPLE or total_rows % _SUBLANE_MULTIPLE != 0:
        # Tiny or irregular row count: take the whole array as one block
        # (block dim == full array dim is always legal).
        return total_rows
    max_rows = max(_BLOCK_BYTES_BUDGET // max(row_bytes, 1), _SUBLANE_MULTIPLE)
    max_rows = (max_rows // _SUBLANE_MULTIPLE) * _SUBLANE_MULTIPLE
    tile = min(total_rows, max_rows)
    while total_rows % tile != 0:
        tile -= _SUBLANE_MULTIPLE
    return tile


class SamplerV2Template:
    """JAX/Pallas port of the abstract SamplerV2Template."""

    def __init__(self, runtime_cfg=None, model_cfg=None):
        self.model_cfg = model_cfg
        self.runtime_cfg = runtime_cfg
        # No parameters in the PyTorch __init__, so nothing to initialize.

    def forward(self, ref, runtime_dict=None):
        # TODO(synk): SamplerV2Template.forward raises NotImplementedError in
        # PyTorch; no concrete sampling math exists to translate, so the
        # kernel is an aliased tile-wise pass-through of `ref`.
        B, N, C = ref.shape
        itemsize = jnp.dtype(ref.dtype).itemsize

        # Collapse (B, N) -> rows: removes the squeezed size-1 leading block
        # dim and lets one large row tile span the whole batch.
        total_rows = B * N
        ref2d = ref.reshape(total_rows, C)

        tile_rows = _pick_tile_rows(total_rows, C * itemsize)
        grid = (total_rows // tile_rows,)
        nbytes = total_rows * C * itemsize

        out2d = pl.pallas_call(
            _sampler_kernel,
            out_shape=jax.ShapeDtypeStruct((total_rows, C), ref.dtype),
            grid_spec=pl.GridSpec(
                grid=grid,
                in_specs=[pl.BlockSpec((tile_rows, C), lambda i: (i, 0))],
                out_specs=pl.BlockSpec((tile_rows, C), lambda i: (i, 0)),
            ),
            # Identity path: alias the input HBM buffer to the output so the
            # default template path does not double its HBM traffic.
            input_output_aliases={0: 0},
            cost_estimate=pl.CostEstimate(
                flops=0, transcendentals=0, bytes_accessed=2 * nbytes),
            compiler_params=pltpu.CompilerParams(
                dimension_semantics=("parallel",),
                vmem_limit_bytes=_VMEM_LIMIT_BYTES,
            ),
        )(ref2d)

        return out2d.reshape(B, N, C), runtime_dict

    __call__ = forward


if __name__ == "__main__":
    key = jax.random.PRNGKey(0)
    B, N, C = 2, 64, 128  # small point cloud: batch=2, 64 points, 128 feature channels
    ref = jax.random.normal(key, (B, N, C), dtype=jnp.float32)

    sampler = SamplerV2Template(runtime_cfg=None, model_cfg=None)
    out, rt = sampler(ref, runtime_dict={})
    out = jax.block_until_ready(out)

    assert out.shape == ref.shape and out.dtype == ref.dtype
    assert jnp.allclose(out, ref)
    print("KERNEL_OK")
</pallas_src>

<mosaic_0001>
module attributes {stable_mosaic.version = 11 : i64} {
  func.func @_sampler_kernel(%arg0: i32, %arg1: memref<128x128xf32, #tpu.memory_space<vmem>>, %arg2: memref<128x128xf32, #tpu.memory_space<vmem>>) attributes {dimension_semantics = [#tpu.dimension_semantics<parallel>], iteration_bounds = array<i64: 1>, scalar_prefetch = 0 : i64, scratch_operands = 0 : i64, tpu.core_type = #tpu.core_type<tc>, window_params = [{transform_indices = @transform_0, window_bounds = array<i64: 128, 128>}, {transform_indices = @transform_1, window_bounds = array<i64: 128, 128>}]} {
    %c0 = arith.constant 0 : index
    %c0_0 = arith.constant 0 : index
    %0 = vector.load %arg1[%c0, %c0_0] : memref<128x128xf32, #tpu.memory_space<vmem>>, vector<128x128xf32>
    %c0_1 = arith.constant 0 : index
    %c0_2 = arith.constant 0 : index
    %1 = vector.load %arg2[%c0_1, %c0_2] : memref<128x128xf32, #tpu.memory_space<vmem>>, vector<128x128xf32>
    tpu.vector_store %arg2[%c0_1, %c0_2], %0 {strides = array<i32>} : memref<128x128xf32, #tpu.memory_space<vmem>>, vector<128x128xf32>,
    return
  }
  func.func @transform_0(%arg0: i32) -> (i32, i32) {
    %c0_i32 = arith.constant 0 : i32
    %c0_i32_0 = arith.constant 0 : i32
    return %arg0, %c0_i32 : i32, i32
  }
  func.func @transform_1(%arg0: i32) -> (i32, i32) {
    %c0_i32 = arith.constant 0 : i32
    %c0_i32_0 = arith.constant 0 : i32
    return %arg0, %c0_i32 : i32, i32
  }
}

</mosaic_0001>

<bundles_post_ra>
// kernel: tpu_custom_call.1
= control target key start
LH: loop header
LB: loop body
LE: loop exit
PB: predicated region body
PF: predicated region fallthrough
CT: control target
= control target key end

     0   :  { %6 = vsyncpa [#allocation3], 0  ;;  %s168_s0 = inlined_call_operand.hbm [shape: f32[128,128], index: 0, kind: input, shape index: {}, may-alias: {0,1}]   ;;  %s169_s1 = inlined_call_operand.hbm [shape: f32[128,128], index: 1, kind: output, shape index: {}, may-alias: {0,1}]  }
   0x1   :  { %7 = vsyncpa [#allocation4], 0  ;;  %s124_s6 = smov [#allocation2]   ;;  %s76_s10 = scalar_lea.hbm %s168_s0, 2048 }
   0x2   :  { %s13_s7 = sshll.u32 %s124_s6, 4  ;;  %p77_p0 = scmp.ne.s32.totalorder %s168_s0, %s76_s10  ;;  %s14_s7 = int_to_ptr.vmem [resolvable:$true] %s13_s7 }
   0x3   :  { %p80_p1 = scmp.lt.u32.totalorder %s76_s10, %s168_s0 }
   0x5   :  { %p82_p2 = pnand %p80_p1, %p77_p0 }
   0x7   :  { %85 = shalt.err (!%p82_p2)
}
   0x8   :  { %s86_s15 = scalar_lea.vmem %s14_s7, 2048  ;;  %p91_p4 = scmp.lt.s32.totalorder %s14_s7, %s14_s7 }
   0x9   :  { %p87_p3 = scmp.ne.s32.totalorder %s14_s7, %s86_s15  ;;  %p92_p5 = scmp.lt.s32.totalorder %s86_s15, %s86_s15 }
   0xb   :  { %p93_p6 = por %p92_p5, %p91_p4 }
   0xd   :  { %p94_p7 = pnand %p93_p6, %p87_p3 }
   0xf   :  { %97 = shalt.err (!%p94_p7)
}
  0x10   :  { %s125_s16 = smov 128   ;;  %s126_s17 = smov 8  }
  0x11   :  { %19 = dma.hbm_to_vmem [thread:$0]  %s168_s0, 2048, %s14_s7, [#allocation3], %s125_s16, %s125_s16, %s126_s17  }
  0x12   :  { %120 = dma.done.wait [#allocation3], 2048  }
  0x13   :  { %121 = vsyncadd [#allocation3], 4294965248  ;;  %v23_v0 = vld [vmem:[#allocation2] sm:$0xff]  ;;  %v24_v1 = vld [vmem:[#allocation2 + $0x8] sm:$0xff]  ;;  %s127_s20 = smov [#allocation5]  }
  0x14   :  { %v25_v2 = vld [vmem:[#allocation2 + $0x10] sm:$0xff]  ;;  %39 = vst [vmem:[#allocation5] sm:$0xff] %v23_v0  ;;  %40 = vst [vmem:[#allocation5 + $0x8] sm:$0xff] %v24_v1  ;;  %v26_v3 = vld [vmem:[#allocation2 + $0x18] sm:$0xff]  ;;  %s60_s21 = sshll.u32 %s127_s20, 4  ;;  %s61_s21 = int_to_ptr.vmem [resolvable:$true] %s60_s21 }
  0x15   :  { %41 = vst [vmem:[#allocation5 + $0x10] sm:$0xff] %v25_v2  ;;  %v27_v4 = vld [vmem:[#allocation2 + $0x20] sm:$0xff]  ;;  %v28_v5 = vld [vmem:[#allocation2 + $0x28] sm:$0xff]  ;;  %42 = vst [vmem:[#allocation5 + $0x18] sm:$0xff] %v26_v3  ;;  %s98_s0 = scalar_lea.vmem %s61_s21, 2048  ;;  %p103_p9 = scmp.lt.s32.totalorder %s61_s21, %s61_s21 }
  0x16   :  { %43 = vst [vmem:[#allocation5 + $0x20] sm:$0xff] %v27_v4  ;;  %44 = vst [vmem:[#allocation5 + $0x28] sm:$0xff] %v28_v5  ;;  %v29_v6 = vld [vmem:[#allocation2 + $0x30] sm:$0xff]  ;;  %v30_v7 = vld [vmem:[#allocation2 + $0x38] sm:$0xff]  ;;  %p99_p8 = scmp.ne.s32.totalorder %s61_s21, %s98_s0  ;;  %p104_p10 = scmp.lt.s32.totalorder %s98_s0, %s98_s0 }
  0x17   :  { %v31_v8 = vld [vmem:[#allocation2 + $0x40] sm:$0xff]  ;;  %45 = vst [vmem:[#allocation5 + $0x30] sm:$0xff] %v29_v6  ;;  %46 = vst [vmem:[#allocation5 + $0x38] sm:$0xff] %v30_v7  ;;  %v32_v9 = vld [vmem:[#allocation2 + $0x48] sm:$0xff] }
  0x18   :  { %47 = vst [vmem:[#allocation5 + $0x40] sm:$0xff] %v31_v8  ;;  %v33_v10 = vld [vmem:[#allocation2 + $0x50] sm:$0xff]  ;;  %v34_v11 = vld [vmem:[#allocation2 + $0x58] sm:$0xff]  ;;  %48 = vst [vmem:[#allocation5 + $0x48] sm:$0xff] %v32_v9  ;;  %p105_p11 = por %p104_p10, %p103_p9 }
  0x19   :  { %49 = vst [vmem:[#allocation5 + $0x50] sm:$0xff] %v33_v10  ;;  %50 = vst [vmem:[#allocation5 + $0x58] sm:$0xff] %v34_v11  ;;  %v35_v12 = vld [vmem:[#allocation2 + $0x60] sm:$0xff]  ;;  %v36_v13 = vld [vmem:[#allocation2 + $0x68] sm:$0xff] }
  0x1a   :  { %v37_v14 = vld [vmem:[#allocation2 + $0x70] sm:$0xff]  ;;  %51 = vst [vmem:[#allocation5 + $0x60] sm:$0xff] %v35_v12  ;;  %52 = vst [vmem:[#allocation5 + $0x68] sm:$0xff] %v36_v13  ;;  %v38_v15 = vld [vmem:[#allocation2 + $0x78] sm:$0xff]  ;;  %p106_p12 = pnand %p105_p11, %p99_p8 }
  0x1b   :  { %53 = vst [vmem:[#allocation5 + $0x70] sm:$0xff] %v37_v14  ;;  %54 = vst [vmem:[#allocation5 + $0x78] sm:$0xff] %v38_v15 }
  0x1c   :  { %109 = shalt.err (!%p106_p12)
}
  0x1d   :  { %s110_s24 = scalar_lea.hbm %s169_s1, 2048 }
  0x1e   :  { %p111_p13 = scmp.ne.s32.totalorder %s169_s1, %s110_s24  ;;  %p114_p0 = scmp.lt.u32.totalorder %s110_s24, %s169_s1 }
  0x20   :  { %p116_p1 = pnand %p114_p0, %p111_p13 }
  0x22   :  { %119 = shalt.err (!%p116_p1)
}
  0x23   :  { %66 = dma.vmem_to_hbm [thread:$0]  %s61_s21, 2048, %s169_s1, [#allocation4], %s125_s16, %s125_s16, %s126_s17  }
  0x24   :  { %122 = dma.done.wait [#allocation4], 2048  }
  0x25   :  { %123 = vsyncadd [#allocation4], 4294965248 }
  0x26   :  { %70 = vsyncpa [#allocation3], 1 }
  0x27   :  { %71 = vsyncpa [#allocation4], 1 }

</bundles_post_ra>
